<compile_context>
chip_gen: v5e
topology: v5e:2x2
jax: 0.10.0
libtpu: 0.0.40
codegen_flags: <defaults>
</compile_context>

<pallas_src>
import functools
import math

import jax
import jax.numpy as jnp
from jax import lax
from jax.experimental import pallas as pl
from jax.experimental.pallas import tpu as pltpu


# ----------------------------------------------------------------------------
# Tiled linear:  y = x @ W + b   (bias folded into the K-loop accumulator init)
# ----------------------------------------------------------------------------
def _linear_kernel(x_ref, w_ref, b_ref, o_ref, acc_ref):
    k = pl.program_id(2)

    @pl.when(k == 0)
    def _():
        # Fold the bias into the accumulator init (one broadcast per tile,
        # no re-broadcast inside the K loop, no extra add in the epilogue).
        acc_ref[...] = jnp.zeros_like(acc_ref) + b_ref[...]

    acc_ref[...] += jnp.dot(
        x_ref[...], w_ref[...], preferred_element_type=jnp.float32
    )

    @pl.when(k == pl.num_programs(2) - 1)
    def _():
        o_ref[...] = acc_ref[...].astype(o_ref.dtype)


def _pick_tile(dim, target, multiple):
    """Largest tile <= target that divides `dim` and is a multiple of
    `multiple`; falls back to the full dimension (always legal)."""
    if dim <= target:
        return dim
    t = (target // multiple) * multiple
    while t >= multiple:
        if dim % t == 0:
            return t
        t -= multiple
    return dim


def pallas_linear(x2d, w, b, *, tm_target=256, tn_target=512, tk_target=512):
    """y = x2d @ w + b   (x2d: (M, K), w: (K, N), b: (N,))."""
    M, K = x2d.shape
    K2, N = w.shape
    assert K == K2
    tm = _pick_tile(M, tm_target, 8)
    tn = _pick_tile(N, tn_target, 128)
    tk = _pick_tile(K, tk_target, 128)

    return pl.pallas_call(
        _linear_kernel,
        out_shape=jax.ShapeDtypeStruct((M, N), jnp.float32),
        grid=(M // tm, N // tn, K // tk),
        in_specs=[
            pl.BlockSpec((tm, tk), lambda i, j, k: (i, k)),
            pl.BlockSpec((tk, tn), lambda i, j, k: (k, j)),
            pl.BlockSpec((1, tn), lambda i, j, k: (0, j)),
        ],
        out_specs=pl.BlockSpec((tm, tn), lambda i, j, k: (i, j)),
        scratch_shapes=[pltpu.VMEM((tm, tn), jnp.float32)],
        compiler_params=pltpu.CompilerParams(
            dimension_semantics=("parallel", "parallel", "arbitrary")
        ),
    )(x2d, w, b.reshape(1, N))


# ----------------------------------------------------------------------------
# Attention: one grid step per batch element, all heads per step, merged-head
# (L, E) output written directly (absorbs permute(0,2,1,3).reshape).
# ----------------------------------------------------------------------------
def _attention_kernel(q_ref, k_ref, v_ref, bias_ref, o_ref, *, scale, heads):
    # Per-batch tile: q/k/v are (H, L, D); bias is (1, L); o is (L, H*D).
    bias = bias_ref[...]                      # additive mask bias, hoisted
    outs = []
    for h in range(heads):                    # static unroll over heads
        # Fold the 1/sqrt(D) scale into q (L*D muls instead of L*L on scores).
        qh = q_ref[h] * scale
        kh = k_ref[h]
        vh = v_ref[h]
        # NT matmul: contract the last dims directly (no k.T relayout / XLU).
        s = lax.dot_general(
            qh, kh,
            dimension_numbers=(((1,), (1,)), ((), ())),
            preferred_element_type=jnp.float32,
        )
        s = s + bias                          # (L, L) + (1, L) key-axis bcast
        s = s - jnp.max(s, axis=-1, keepdims=True)
        p = jnp.exp(s)
        # Softmax denominator via the EUP approximate reciprocal (free slot).
        p = p * pl.reciprocal(jnp.sum(p, axis=-1, keepdims=True), approx=True)
        outs.append(jnp.dot(p, vh, preferred_element_type=jnp.float32))
    # Merge heads along lanes -> one lane-dense (L, E) store.  This realizes
    # the PyTorch permute(0, 2, 1, 3).reshape(B, L, E) inside the kernel.
    o_ref[...] = jnp.concatenate(outs, axis=-1).astype(o_ref.dtype)


def pallas_attention(q, k, v, mask_bias, head_dim):
    """q, k, v: (B, H, L, D); mask_bias: (B, 1, L) f32 -> (B, L, H*D)."""
    B, H, L, D = q.shape
    scale = 1.0 / math.sqrt(head_dim)
    kern = functools.partial(_attention_kernel, scale=scale, heads=H)
    qkv_spec = pl.BlockSpec((None, H, L, D), lambda b: (b, 0, 0, 0))
    return pl.pallas_call(
        kern,
        out_shape=jax.ShapeDtypeStruct((B, L, H * D), jnp.float32),
        grid=(B,),
        in_specs=[
            qkv_spec,
            qkv_spec,
            qkv_spec,
            pl.BlockSpec((None, 1, L), lambda b: (b, 0, 0)),
        ],
        out_specs=pl.BlockSpec((None, L, H * D), lambda b: (b, 0, 0)),
        compiler_params=pltpu.CompilerParams(
            dimension_semantics=("parallel",)
        ),
    )(q, k, v, mask_bias)


# ----------------------------------------------------------------------------
# Parameter fusion (one-time, at load) and forward pass
# ----------------------------------------------------------------------------
def prepare_fused_params(params):
    """Fuse Q/K/V weights into one (E, 3E) GEMM operand.  Do this ONCE at
    parameter-load time, never inside the per-step forward."""
    return {
        "wqkv": jnp.concatenate([params["wq"], params["wk"], params["wv"]], axis=1),
        "bqkv": jnp.concatenate([params["bq"], params["bk"], params["bv"]], axis=0),
        "wo": params["wo"],
        "bo": params["bo"],
    }


def multi_head_attention_block(x, mask, fused_params, heads):
    B, L, E = x.shape
    D = E // heads
    x2 = x.reshape(B * L, E)

    # Fused QKV projection: one GEMM with the pre-fused (E, 3E) weight -> x is
    # read from HBM once, 3x wider N for the MXU.
    qkv = pallas_linear(x2, fused_params["wqkv"], fused_params["bqkv"])  # (B*L, 3E)

    # separate_heads: raw reshape (B, L, E) -> (B, H, L, D), exactly as torch.
    q = qkv[:, :E].reshape(B, heads, L, D)
    k = qkv[:, E:2 * E].reshape(B, heads, L, D)
    v = qkv[:, 2 * E:].reshape(B, heads, L, D)

    # Additive f32 mask bias (0 keep / -1e10 masked), shared across heads and
    # query rows.  Identical to masked_fill for padding masks (masked keys'
    # exp underflows to exactly 0 either way).
    mask_bias = jnp.where(mask == 0, jnp.float32(-1e10), jnp.float32(0.0))
    mask_bias = mask_bias.reshape(B, 1, L)

    attn = pallas_attention(q, k, v, mask_bias, D)          # (B, L, E), merged

    out = pallas_linear(
        attn.reshape(B * L, E), fused_params["wo"], fused_params["bo"]
    )
    return out.reshape(B, L, E)


# pure-JAX reference with the PyTorch module's semantics, for correctness check
def reference_forward(x, mask, params, heads):
    B, L, E = x.shape
    D = E // heads
    q = x @ params["wq"] + params["bq"]
    k = x @ params["wk"] + params["bk"]
    v = x @ params["wv"] + params["bv"]
    q = q.reshape(B, heads, L, D)
    k = k.reshape(B, heads, L, D)
    v = v.reshape(B, heads, L, D)
    s = jnp.einsum("bhqd,bhkd->bhqk", q, k) / jnp.sqrt(jnp.float32(D))
    m = mask[:, None, None, :]
    s = jnp.where(m == 0, jnp.float32(-1e10), s)
    p = jax.nn.softmax(s, axis=-1)
    o = jnp.einsum("bhqk,bhkd->bhqd", p, v)
    o = o.transpose(0, 2, 1, 3).reshape(B, L, E)
    return o @ params["wo"] + params["bo"]


def init_params(key, embed_size):
    """Deterministic init mimicking nn.Linear defaults (uniform +-1/sqrt(in))."""
    bound = 1.0 / math.sqrt(embed_size)
    names = ["q", "k", "v", "o"]
    keys = jax.random.split(key, 2 * len(names))
    params = {}
    for i, n in enumerate(names):
        params[f"w{n}"] = jax.random.uniform(
            keys[2 * i], (embed_size, embed_size), jnp.float32, -bound, bound
        )
        params[f"b{n}"] = jax.random.uniform(
            keys[2 * i + 1], (embed_size,), jnp.float32, -bound, bound
        )
    return params


if __name__ == "__main__":
    # small shapes consistent with the module
    batch_size = 2
    max_len = 8
    embed_size = 32
    heads = 4
    # word_embedding_dim is stored by the module but unused in forward()

    key = jax.random.PRNGKey(0)
    k_x, k_p = jax.random.split(key)

    x = jax.random.normal(k_x, (batch_size, max_len, embed_size), jnp.float32)
    # padding-style mask: (B, L), 1 = keep, 0 = masked
    lengths = jnp.array([8, 5], dtype=jnp.int32)
    mask = (jnp.arange(max_len)[None, :] < lengths[:, None]).astype(jnp.int32)

    params = init_params(k_p, embed_size)
    fused_params = prepare_fused_params(params)   # one-time fusion

    fwd = jax.jit(functools.partial(multi_head_attention_block, heads=heads))
    out = fwd(x, mask, fused_params)
    out = jax.block_until_ready(out)

    ref = reference_forward(x, mask, params, heads)
    assert out.shape == (batch_size, max_len, embed_size)
    # Tolerance allows for the EUP approximate-reciprocal softmax denominator.
    assert jnp.allclose(out, ref, atol=1e-3, rtol=1e-3), "mismatch vs reference"

    print("KERNEL_OK")
</pallas_src>

<mosaic_0001>
module attributes {stable_mosaic.version = 11 : i64} {
  func.func @_linear_kernel(%arg0: i32, %arg1: i32, %arg2: i32, %arg3: memref<16x32xf32, #tpu.memory_space<vmem>>, %arg4: memref<32x96xf32, #tpu.memory_space<vmem>>, %arg5: memref<1x96xf32, #tpu.memory_space<vmem>>, %arg6: memref<16x96xf32, #tpu.memory_space<vmem>>, %arg7: memref<16x96xf32, #tpu.memory_space<vmem>>) attributes {dimension_semantics = [#tpu.dimension_semantics<parallel>, #tpu.dimension_semantics<parallel>, #tpu.dimension_semantics<arbitrary>], iteration_bounds = array<i64: 1, 1, 1>, scalar_prefetch = 0 : i64, scratch_operands = 1 : i64, tpu.core_type = #tpu.core_type<tc>, window_params = [{transform_indices = @transform_0, window_bounds = array<i64: 16, 32>}, {transform_indices = @transform_1, window_bounds = array<i64: 32, 96>}, {transform_indices = @transform_2, window_bounds = array<i64: 1, 96>}, {transform_indices = @transform_3, window_bounds = array<i64: 16, 96>}]} {
    %c0_i32 = arith.constant 0 : i32
    %0 = arith.cmpi eq, %arg2, %c0_i32 : i32
    %1 = arith.extui %0 : i1 to i32
    %c0_i32_0 = arith.constant 0 : i32
    %2 = arith.cmpi ne, %1, %c0_i32_0 : i32
    scf.if %2 {
      %cst_10 = arith.constant 0.000000e+00 : f32
      %12 = vector.broadcast %cst_10 : f32 to vector<16x96xf32>
      %c0_11 = arith.constant 0 : index
      %c0_12 = arith.constant 0 : index
      %13 = vector.load %arg5[%c0_11, %c0_12] : memref<1x96xf32, #tpu.memory_space<vmem>>, vector<1x96xf32>
      %14 = vector.broadcast %13 : vector<1x96xf32> to vector<16x96xf32>
      %15 = arith.addf %12, %14 : vector<16x96xf32>
      %c0_13 = arith.constant 0 : index
      %c0_14 = arith.constant 0 : index
      %16 = vector.load %arg7[%c0_13, %c0_14] : memref<16x96xf32, #tpu.memory_space<vmem>>, vector<16x96xf32>
      tpu.vector_store %arg7[%c0_13, %c0_14], %15 {strides = array<i32>} : memref<16x96xf32, #tpu.memory_space<vmem>>, vector<16x96xf32>,
    } else {
    }
    %c0 = arith.constant 0 : index
    %c0_1 = arith.constant 0 : index
    %3 = vector.load %arg7[%c0, %c0_1] : memref<16x96xf32, #tpu.memory_space<vmem>>, vector<16x96xf32>
    %c0_2 = arith.constant 0 : index
    %c0_3 = arith.constant 0 : index
    %4 = vector.load %arg3[%c0_2, %c0_3] : memref<16x32xf32, #tpu.memory_space<vmem>>, vector<16x32xf32>
    %c0_4 = arith.constant 0 : index
    %c0_5 = arith.constant 0 : index
    %5 = vector.load %arg4[%c0_4, %c0_5] : memref<32x96xf32, #tpu.memory_space<vmem>>, vector<32x96xf32>
    %cst = arith.constant dense<0.000000e+00> : vector<16x96xf32>
    %6 = tpu.matmul %4, %5, %cst {dimension_numbers = #tpu.dot_dimension_numbers<[1], [0], [0], [1], [0, 0, 1, 1], [], []>} : vector<16x32xf32>, vector<32x96xf32>, vector<16x96xf32> -> vector<16x96xf32>
    %7 = arith.addf %3, %6 : vector<16x96xf32>
    %c0_6 = arith.constant 0 : index
    %c0_7 = arith.constant 0 : index
    %8 = vector.load %arg7[%c0_6, %c0_7] : memref<16x96xf32, #tpu.memory_space<vmem>>, vector<16x96xf32>
    tpu.vector_store %arg7[%c0_6, %c0_7], %7 {strides = array<i32>} : memref<16x96xf32, #tpu.memory_space<vmem>>, vector<16x96xf32>,
    %c0_i32_8 = arith.constant 0 : i32
    %9 = arith.cmpi eq, %arg2, %c0_i32_8 : i32
    %10 = arith.extui %9 : i1 to i32
    %c0_i32_9 = arith.constant 0 : i32
    %11 = arith.cmpi ne, %10, %c0_i32_9 : i32
    scf.if %11 {
      %c0_10 = arith.constant 0 : index
      %c0_11 = arith.constant 0 : index
      %12 = vector.load %arg7[%c0_10, %c0_11] : memref<16x96xf32, #tpu.memory_space<vmem>>, vector<16x96xf32>
      %c0_12 = arith.constant 0 : index
      %c0_13 = arith.constant 0 : index
      %13 = vector.load %arg6[%c0_12, %c0_13] : memref<16x96xf32, #tpu.memory_space<vmem>>, vector<16x96xf32>
      tpu.vector_store %arg6[%c0_12, %c0_13], %12 {strides = array<i32>} : memref<16x96xf32, #tpu.memory_space<vmem>>, vector<16x96xf32>,
    } else {
    }
    return
  }
  func.func @transform_0(%arg0: i32, %arg1: i32, %arg2: i32) -> (i32, i32) {
    %c0_i32 = arith.constant 0 : i32
    return %arg0, %arg2 : i32, i32
  }
  func.func @transform_1(%arg0: i32, %arg1: i32, %arg2: i32) -> (i32, i32) {
    %c0_i32 = arith.constant 0 : i32
    return %arg2, %arg1 : i32, i32
  }
  func.func @transform_2(%arg0: i32, %arg1: i32, %arg2: i32) -> (i32, i32) {
    %c0_i32 = arith.constant 0 : i32
    %c0_i32_0 = arith.constant 0 : i32
    return %c0_i32, %arg1 : i32, i32
  }
  func.func @transform_3(%arg0: i32, %arg1: i32, %arg2: i32) -> (i32, i32) {
    %c0_i32 = arith.constant 0 : i32
    return %arg0, %arg1 : i32, i32
  }
}

module attributes {stable_mosaic.version = 11 : i64} {
  func.func @_linear_kernel(%arg0: i32, %arg1: i32, %arg2: i32, %arg3: memref<16x32xf32, #tpu.memory_space<vmem>>, %arg4: memref<32x32xf32, #tpu.memory_space<vmem>>, %arg5: memref<1x32xf32, #tpu.memory_space<vmem>>, %arg6: memref<16x32xf32, #tpu.memory_space<vmem>>, %arg7: memref<16x32xf32, #tpu.memory_space<vmem>>) attributes {dimension_semantics = [#tpu.dimension_semantics<parallel>, #tpu.dimension_semantics<parallel>, #tpu.dimension_semantics<arbitrary>], iteration_bounds = array<i64: 1, 1, 1>, scalar_prefetch = 0 : i64, scratch_operands = 1 : i64, tpu.core_type = #tpu.core_type<tc>, window_params = [{transform_indices = @transform_0, window_bounds = array<i64: 16, 32>}, {transform_indices = @transform_1, window_bounds = array<i64: 32, 32>}, {transform_indices = @transform_2, window_bounds = array<i64: 1, 32>}, {transform_indices = @transform_3, window_bounds = array<i64: 16, 32>}]} {
    %c0_i32 = arith.constant 0 : i32
    %0 = arith.cmpi eq, %arg2, %c0_i32 : i32
    %1 = arith.extui %0 : i1 to i32
    %c0_i32_0 = arith.constant 0 : i32
    %2 = arith.cmpi ne, %1, %c0_i32_0 : i32
    scf.if %2 {
      %cst_10 = arith.constant 0.000000e+00 : f32
      %12 = vector.broadcast %cst_10 : f32 to vector<16x32xf32>
      %c0_11 = arith.constant 0 : index
      %c0_12 = arith.constant 0 : index
      %13 = vector.load %arg5[%c0_11, %c0_12] : memref<1x32xf32, #tpu.memory_space<vmem>>, vector<1x32xf32>
      %14 = vector.broadcast %13 : vector<1x32xf32> to vector<16x32xf32>
      %15 = arith.addf %12, %14 : vector<16x32xf32>
      %c0_13 = arith.constant 0 : index
      %c0_14 = arith.constant 0 : index
      %16 = vector.load %arg7[%c0_13, %c0_14] : memref<16x32xf32, #tpu.memory_space<vmem>>, vector<16x32xf32>
      tpu.vector_store %arg7[%c0_13, %c0_14], %15 {strides = array<i32>} : memref<16x32xf32, #tpu.memory_space<vmem>>, vector<16x32xf32>,
    } else {
    }
    %c0 = arith.constant 0 : index
    %c0_1 = arith.constant 0 : index
    %3 = vector.load %arg7[%c0, %c0_1] : memref<16x32xf32, #tpu.memory_space<vmem>>, vector<16x32xf32>
    %c0_2 = arith.constant 0 : index
    %c0_3 = arith.constant 0 : index
    %4 = vector.load %arg3[%c0_2, %c0_3] : memref<16x32xf32, #tpu.memory_space<vmem>>, vector<16x32xf32>
    %c0_4 = arith.constant 0 : index
    %c0_5 = arith.constant 0 : index
    %5 = vector.load %arg4[%c0_4, %c0_5] : memref<32x32xf32, #tpu.memory_space<vmem>>, vector<32x32xf32>
    %cst = arith.constant dense<0.000000e+00> : vector<16x32xf32>
    %6 = tpu.matmul %4, %5, %cst {dimension_numbers = #tpu.dot_dimension_numbers<[1], [0], [0], [1], [0, 0, 1, 1], [], []>} : vector<16x32xf32>, vector<32x32xf32>, vector<16x32xf32> -> vector<16x32xf32>
    %7 = arith.addf %3, %6 : vector<16x32xf32>
    %c0_6 = arith.constant 0 : index
    %c0_7 = arith.constant 0 : index
    %8 = vector.load %arg7[%c0_6, %c0_7] : memref<16x32xf32, #tpu.memory_space<vmem>>, vector<16x32xf32>
    tpu.vector_store %arg7[%c0_6, %c0_7], %7 {strides = array<i32>} : memref<16x32xf32, #tpu.memory_space<vmem>>, vector<16x32xf32>,
    %c0_i32_8 = arith.constant 0 : i32
    %9 = arith.cmpi eq, %arg2, %c0_i32_8 : i32
    %10 = arith.extui %9 : i1 to i32
    %c0_i32_9 = arith.constant 0 : i32
    %11 = arith.cmpi ne, %10, %c0_i32_9 : i32
    scf.if %11 {
      %c0_10 = arith.constant 0 : index
      %c0_11 = arith.constant 0 : index
      %12 = vector.load %arg7[%c0_10, %c0_11] : memref<16x32xf32, #tpu.memory_space<vmem>>, vector<16x32xf32>
      %c0_12 = arith.constant 0 : index
      %c0_13 = arith.constant 0 : index
      %13 = vector.load %arg6[%c0_12, %c0_13] : memref<16x32xf32, #tpu.memory_space<vmem>>, vector<16x32xf32>
      tpu.vector_store %arg6[%c0_12, %c0_13], %12 {strides = array<i32>} : memref<16x32xf32, #tpu.memory_space<vmem>>, vector<16x32xf32>,
    } else {
    }
    return
  }
  func.func @transform_0(%arg0: i32, %arg1: i32, %arg2: i32) -> (i32, i32) {
    %c0_i32 = arith.constant 0 : i32
    return %arg0, %arg2 : i32, i32
  }
  func.func @transform_1(%arg0: i32, %arg1: i32, %arg2: i32) -> (i32, i32) {
    %c0_i32 = arith.constant 0 : i32
    return %arg2, %arg1 : i32, i32
  }
  func.func @transform_2(%arg0: i32, %arg1: i32, %arg2: i32) -> (i32, i32) {
    %c0_i32 = arith.constant 0 : i32
    %c0_i32_0 = arith.constant 0 : i32
    return %c0_i32, %arg1 : i32, i32
  }
  func.func @transform_3(%arg0: i32, %arg1: i32, %arg2: i32) -> (i32, i32) {
    %c0_i32 = arith.constant 0 : i32
    return %arg0, %arg1 : i32, i32
  }
}

module attributes {stable_mosaic.version = 11 : i64} {
  func.func @_attention_kernel(%arg0: i32, %arg1: memref<1x4x8x8xf32, #tpu.memory_space<vmem>>, %arg2: memref<1x4x8x8xf32, #tpu.memory_space<vmem>>, %arg3: memref<1x4x8x8xf32, #tpu.memory_space<vmem>>, %arg4: memref<1x1x8xf32, #tpu.memory_space<vmem>>, %arg5: memref<1x8x32xf32, #tpu.memory_space<vmem>>) attributes {dimension_semantics = [#tpu.dimension_semantics<parallel>], iteration_bounds = array<i64: 2>, scalar_prefetch = 0 : i64, scratch_operands = 0 : i64, tpu.core_type = #tpu.core_type<tc>, window_params = [{transform_indices = @transform_0, window_bounds = array<i64: 1, 4, 8, 8>}, {transform_indices = @transform_1, window_bounds = array<i64: 1, 4, 8, 8>}, {transform_indices = @transform_2, window_bounds = array<i64: 1, 4, 8, 8>}, {transform_indices = @transform_3, window_bounds = array<i64: 1, 1, 8>}, {transform_indices = @transform_4, window_bounds = array<i64: 1, 8, 32>}]} {
    %c0 = arith.constant 0 : index
    %c0_0 = arith.constant 0 : index
    %c0_1 = arith.constant 0 : index
    %0 = vector.load %arg4[%c0, %c0_0, %c0_1] : memref<1x1x8xf32, #tpu.memory_space<vmem>>, vector<1x1x8xf32>
    %1 = vector.shape_cast %0 : vector<1x1x8xf32> to vector<1x8xf32>
    %c0_2 = arith.constant 0 : index
    %c0_3 = arith.constant 0 : index
    %c0_4 = arith.constant 0 : index
    %c0_5 = arith.constant 0 : index
    %2 = vector.load %arg1[%c0_2, %c0_3, %c0_4, %c0_5] : memref<1x4x8x8xf32, #tpu.memory_space<vmem>>, vector<1x1x8x8xf32>
    %3 = vector.shape_cast %2 : vector<1x1x8x8xf32> to vector<8x8xf32>
    %cst = arith.constant 0.353553385 : f32
    %4 = vector.broadcast %cst : f32 to vector<8x8xf32>
    %5 = arith.mulf %3, %4 : vector<8x8xf32>
    %c0_6 = arith.constant 0 : index
    %c0_7 = arith.constant 0 : index
    %c0_8 = arith.constant 0 : index
    %c0_9 = arith.constant 0 : index
    %6 = vector.load %arg2[%c0_6, %c0_7, %c0_8, %c0_9] : memref<1x4x8x8xf32, #tpu.memory_space<vmem>>, vector<1x1x8x8xf32>
    %7 = vector.shape_cast %6 : vector<1x1x8x8xf32> to vector<8x8xf32>
    %c0_10 = arith.constant 0 : index
    %c0_11 = arith.constant 0 : index
    %c0_12 = arith.constant 0 : index
    %c0_13 = arith.constant 0 : index
    %8 = vector.load %arg3[%c0_10, %c0_11, %c0_12, %c0_13] : memref<1x4x8x8xf32, #tpu.memory_space<vmem>>, vector<1x1x8x8xf32>
    %9 = vector.shape_cast %8 : vector<1x1x8x8xf32> to vector<8x8xf32>
    %cst_14 = arith.constant dense<0.000000e+00> : vector<8x8xf32>
    %10 = tpu.matmul %5, %7, %cst_14 {dimension_numbers = #tpu.dot_dimension_numbers<[1], [1], [0], [0], [0, 0, 1, 0], [], []>} : vector<8x8xf32>, vector<8x8xf32>, vector<8x8xf32> -> vector<8x8xf32>
    %11 = vector.broadcast %1 : vector<1x8xf32> to vector<8x8xf32>
    %12 = arith.addf %10, %11 : vector<8x8xf32>
    %cst_15 = arith.constant dense<0xFF800000> : vector<8xf32>
    %13 = vector.multi_reduction <maximumf>, %12, %cst_15 [1] : vector<8x8xf32> to vector<8xf32>
    %14 = vector.shape_cast %13 : vector<8xf32> to vector<8x1xf32>
    %15 = vector.broadcast %14 : vector<8x1xf32> to vector<8x8xf32>
    %16 = arith.subf %12, %15 : vector<8x8xf32>
    %17 = math.exp %16 : vector<8x8xf32>
    %cst_16 = arith.constant dense<0.000000e+00> : vector<8xf32>
    %18 = vector.multi_reduction <add>, %17, %cst_16 [1] : vector<8x8xf32> to vector<8xf32>
    %19 = vector.shape_cast %18 : vector<8xf32> to vector<8x1xf32>
    %20 = tpu.reciprocal %19 {approx = true} : vector<8x1xf32> -> vector<8x1xf32>
    %21 = vector.broadcast %20 : vector<8x1xf32> to vector<8x8xf32>
    %22 = arith.mulf %17, %21 : vector<8x8xf32>
    %cst_17 = arith.constant dense<0.000000e+00> : vector<8x8xf32>
    %23 = tpu.matmul %22, %9, %cst_17 {dimension_numbers = #tpu.dot_dimension_numbers<[1], [0], [0], [1], [0, 0, 1, 1], [], []>} : vector<8x8xf32>, vector<8x8xf32>, vector<8x8xf32> -> vector<8x8xf32>
    %c0_18 = arith.constant 0 : index
    %c1 = arith.constant 1 : index
    %c0_19 = arith.constant 0 : index
    %c0_20 = arith.constant 0 : index
    %24 = vector.load %arg1[%c0_18, %c1, %c0_19, %c0_20] : memref<1x4x8x8xf32, #tpu.memory_space<vmem>>, vector<1x1x8x8xf32>
    %25 = vector.shape_cast %24 : vector<1x1x8x8xf32> to vector<8x8xf32>
    %cst_21 = arith.constant 0.353553385 : f32
    %26 = vector.broadcast %cst_21 : f32 to vector<8x8xf32>
    %27 = arith.mulf %25, %26 : vector<8x8xf32>
    %c0_22 = arith.constant 0 : index
    %c1_23 = arith.constant 1 : index
    %c0_24 = arith.constant 0 : index
    %c0_25 = arith.constant 0 : index
    %28 = vector.load %arg2[%c0_22, %c1_23, %c0_24, %c0_25] : memref<1x4x8x8xf32, #tpu.memory_space<vmem>>, vector<1x1x8x8xf32>
    %29 = vector.shape_cast %28 : vector<1x1x8x8xf32> to vector<8x8xf32>
    %c0_26 = arith.constant 0 : index
    %c1_27 = arith.constant 1 : index
    %c0_28 = arith.constant 0 : index
    %c0_29 = arith.constant 0 : index
    %30 = vector.load %arg3[%c0_26, %c1_27, %c0_28, %c0_29] : memref<1x4x8x8xf32, #tpu.memory_space<vmem>>, vector<1x1x8x8xf32>
    %31 = vector.shape_cast %30 : vector<1x1x8x8xf32> to vector<8x8xf32>
    %cst_30 = arith.constant dense<0.000000e+00> : vector<8x8xf32>
    %32 = tpu.matmul %27, %29, %cst_30 {dimension_numbers = #tpu.dot_dimension_numbers<[1], [1], [0], [0], [0, 0, 1, 0], [], []>} : vector<8x8xf32>, vector<8x8xf32>, vector<8x8xf32> -> vector<8x8xf32>
    %33 = vector.broadcast %1 : vector<1x8xf32> to vector<8x8xf32>
    %34 = arith.addf %32, %33 : vector<8x8xf32>
    %cst_31 = arith.constant dense<0xFF800000> : vector<8xf32>
    %35 = vector.multi_reduction <maximumf>, %34, %cst_31 [1] : vector<8x8xf32> to vector<8xf32>
    %36 = vector.shape_cast %35 : vector<8xf32> to vector<8x1xf32>
    %37 = vector.broadcast %36 : vector<8x1xf32> to vector<8x8xf32>
    %38 = arith.subf %34, %37 : vector<8x8xf32>
    %39 = math.exp %38 : vector<8x8xf32>
    %cst_32 = arith.constant dense<0.000000e+00> : vector<8xf32>
    %40 = vector.multi_reduction <add>, %39, %cst_32 [1] : vector<8x8xf32> to vector<8xf32>
    %41 = vector.shape_cast %40 : vector<8xf32> to vector<8x1xf32>
    %42 = tpu.reciprocal %41 {approx = true} : vector<8x1xf32> -> vector<8x1xf32>
    %43 = vector.broadcast %42 : vector<8x1xf32> to vector<8x8xf32>
    %44 = arith.mulf %39, %43 : vector<8x8xf32>
    %cst_33 = arith.constant dense<0.000000e+00> : vector<8x8xf32>
    %45 = tpu.matmul %44, %31, %cst_33 {dimension_numbers = #tpu.dot_dimension_numbers<[1], [0], [0], [1], [0, 0, 1, 1], [], []>} : vector<8x8xf32>, vector<8x8xf32>, vector<8x8xf32> -> vector<8x8xf32>
    %c0_34 = arith.constant 0 : index
    %c2 = arith.constant 2 : index
    %c0_35 = arith.constant 0 : index
    %c0_36 = arith.constant 0 : index
    %46 = vector.load %arg1[%c0_34, %c2, %c0_35, %c0_36] : memref<1x4x8x8xf32, #tpu.memory_space<vmem>>, vector<1x1x8x8xf32>
    %47 = vector.shape_cast %46 : vector<1x1x8x8xf32> to vector<8x8xf32>
    %cst_37 = arith.constant 0.353553385 : f32
    %48 = vector.broadcast %cst_37 : f32 to vector<8x8xf32>
    %49 = arith.mulf %47, %48 : vector<8x8xf32>
    %c0_38 = arith.constant 0 : index
    %c2_39 = arith.constant 2 : index
    %c0_40 = arith.constant 0 : index
    %c0_41 = arith.constant 0 : index
    %50 = vector.load %arg2[%c0_38, %c2_39, %c0_40, %c0_41] : memref<1x4x8x8xf32, #tpu.memory_space<vmem>>, vector<1x1x8x8xf32>
    %51 = vector.shape_cast %50 : vector<1x1x8x8xf32> to vector<8x8xf32>
    %c0_42 = arith.constant 0 : index
    %c2_43 = arith.constant 2 : index
    %c0_44 = arith.constant 0 : index
    %c0_45 = arith.constant 0 : index
    %52 = vector.load %arg3[%c0_42, %c2_43, %c0_44, %c0_45] : memref<1x4x8x8xf32, #tpu.memory_space<vmem>>, vector<1x1x8x8xf32>
    %53 = vector.shape_cast %52 : vector<1x1x8x8xf32> to vector<8x8xf32>
    %cst_46 = arith.constant dense<0.000000e+00> : vector<8x8xf32>
    %54 = tpu.matmul %49, %51, %cst_46 {dimension_numbers = #tpu.dot_dimension_numbers<[1], [1], [0], [0], [0, 0, 1, 0], [], []>} : vector<8x8xf32>, vector<8x8xf32>, vector<8x8xf32> -> vector<8x8xf32>
    %55 = vector.broadcast %1 : vector<1x8xf32> to vector<8x8xf32>
    %56 = arith.addf %54, %55 : vector<8x8xf32>
    %cst_47 = arith.constant dense<0xFF800000> : vector<8xf32>
    %57 = vector.multi_reduction <maximumf>, %56, %cst_47 [1] : vector<8x8xf32> to vector<8xf32>
    %58 = vector.shape_cast %57 : vector<8xf32> to vector<8x1xf32>
    %59 = vector.broadcast %58 : vector<8x1xf32> to vector<8x8xf32>
    %60 = arith.subf %56, %59 : vector<8x8xf32>
    %61 = math.exp %60 : vector<8x8xf32>
    %cst_48 = arith.constant dense<0.000000e+00> : vector<8xf32>
    %62 = vector.multi_reduction <add>, %61, %cst_48 [1] : vector<8x8xf32> to vector<8xf32>
    %63 = vector.shape_cast %62 : vector<8xf32> to vector<8x1xf32>
    %64 = tpu.reciprocal %63 {approx = true} : vector<8x1xf32> -> vector<8x1xf32>
    %65 = vector.broadcast %64 : vector<8x1xf32> to vector<8x8xf32>
    %66 = arith.mulf %61, %65 : vector<8x8xf32>
    %cst_49 = arith.constant dense<0.000000e+00> : vector<8x8xf32>
    %67 = tpu.matmul %66, %53, %cst_49 {dimension_numbers = #tpu.dot_dimension_numbers<[1], [0], [0], [1], [0, 0, 1, 1], [], []>} : vector<8x8xf32>, vector<8x8xf32>, vector<8x8xf32> -> vector<8x8xf32>
    %c0_50 = arith.constant 0 : index
    %c3 = arith.constant 3 : index
    %c0_51 = arith.constant 0 : index
    %c0_52 = arith.constant 0 : index
    %68 = vector.load %arg1[%c0_50, %c3, %c0_51, %c0_52] : memref<1x4x8x8xf32, #tpu.memory_space<vmem>>, vector<1x1x8x8xf32>
    %69 = vector.shape_cast %68 : vector<1x1x8x8xf32> to vector<8x8xf32>
    %cst_53 = arith.constant 0.353553385 : f32
    %70 = vector.broadcast %cst_53 : f32 to vector<8x8xf32>
    %71 = arith.mulf %69, %70 : vector<8x8xf32>
    %c0_54 = arith.constant 0 : index
    %c3_55 = arith.constant 3 : index
    %c0_56 = arith.constant 0 : index
    %c0_57 = arith.constant 0 : index
    %72 = vector.load %arg2[%c0_54, %c3_55, %c0_56, %c0_57] : memref<1x4x8x8xf32, #tpu.memory_space<vmem>>, vector<1x1x8x8xf32>
    %73 = vector.shape_cast %72 : vector<1x1x8x8xf32> to vector<8x8xf32>
    %c0_58 = arith.constant 0 : index
    %c3_59 = arith.constant 3 : index
    %c0_60 = arith.constant 0 : index
    %c0_61 = arith.constant 0 : index
    %74 = vector.load %arg3[%c0_58, %c3_59, %c0_60, %c0_61] : memref<1x4x8x8xf32, #tpu.memory_space<vmem>>, vector<1x1x8x8xf32>
    %75 = vector.shape_cast %74 : vector<1x1x8x8xf32> to vector<8x8xf32>
    %cst_62 = arith.constant dense<0.000000e+00> : vector<8x8xf32>
    %76 = tpu.matmul %71, %73, %cst_62 {dimension_numbers = #tpu.dot_dimension_numbers<[1], [1], [0], [0], [0, 0, 1, 0], [], []>} : vector<8x8xf32>, vector<8x8xf32>, vector<8x8xf32> -> vector<8x8xf32>
    %77 = vector.broadcast %1 : vector<1x8xf32> to vector<8x8xf32>
    %78 = arith.addf %76, %77 : vector<8x8xf32>
    %cst_63 = arith.constant dense<0xFF800000> : vector<8xf32>
    %79 = vector.multi_reduction <maximumf>, %78, %cst_63 [1] : vector<8x8xf32> to vector<8xf32>
    %80 = vector.shape_cast %79 : vector<8xf32> to vector<8x1xf32>
    %81 = vector.broadcast %80 : vector<8x1xf32> to vector<8x8xf32>
    %82 = arith.subf %78, %81 : vector<8x8xf32>
    %83 = math.exp %82 : vector<8x8xf32>
    %cst_64 = arith.constant dense<0.000000e+00> : vector<8xf32>
    %84 = vector.multi_reduction <add>, %83, %cst_64 [1] : vector<8x8xf32> to vector<8xf32>
    %85 = vector.shape_cast %84 : vector<8xf32> to vector<8x1xf32>
    %86 = tpu.reciprocal %85 {approx = true} : vector<8x1xf32> -> vector<8x1xf32>
    %87 = vector.broadcast %86 : vector<8x1xf32> to vector<8x8xf32>
    %88 = arith.mulf %83, %87 : vector<8x8xf32>
    %cst_65 = arith.constant dense<0.000000e+00> : vector<8x8xf32>
    %89 = tpu.matmul %88, %75, %cst_65 {dimension_numbers = #tpu.dot_dimension_numbers<[1], [0], [0], [1], [0, 0, 1, 1], [], []>} : vector<8x8xf32>, vector<8x8xf32>, vector<8x8xf32> -> vector<8x8xf32>
    %90 = tpu.concatenate %23, %45, %67, %89 in 1 : vector<8x8xf32>, vector<8x8xf32>, vector<8x8xf32>, vector<8x8xf32> -> vector<8x32xf32>
    %c0_66 = arith.constant 0 : index
    %c0_67 = arith.constant 0 : index
    %c0_68 = arith.constant 0 : index
    %91 = vector.load %arg5[%c0_66, %c0_67, %c0_68] : memref<1x8x32xf32, #tpu.memory_space<vmem>>, vector<1x8x32xf32>
    %92 = vector.shape_cast %91 : vector<1x8x32xf32> to vector<8x32xf32>
    %93 = vector.shape_cast %90 : vector<8x32xf32> to vector<1x8x32xf32>
    tpu.vector_store %arg5[%c0_66, %c0_67, %c0_68], %93 {strides = array<i32>} : memref<1x8x32xf32, #tpu.memory_space<vmem>>, vector<1x8x32xf32>,
    return
  }
  func.func @transform_0(%arg0: i32) -> (i32, i32, i32, i32) {
    %c0_i32 = arith.constant 0 : i32
    %c0_i32_0 = arith.constant 0 : i32
    %c0_i32_1 = arith.constant 0 : i32
    %c0_i32_2 = arith.constant 0 : i32
    return %arg0, %c0_i32, %c0_i32_0, %c0_i32_1 : i32, i32, i32, i32
  }
  func.func @transform_1(%arg0: i32) -> (i32, i32, i32, i32) {
    %c0_i32 = arith.constant 0 : i32
    %c0_i32_0 = arith.constant 0 : i32
    %c0_i32_1 = arith.constant 0 : i32
    %c0_i32_2 = arith.constant 0 : i32
    return %arg0, %c0_i32, %c0_i32_0, %c0_i32_1 : i32, i32, i32, i32
  }
  func.func @transform_2(%arg0: i32) -> (i32, i32, i32, i32) {
    %c0_i32 = arith.constant 0 : i32
    %c0_i32_0 = arith.constant 0 : i32
    %c0_i32_1 = arith.constant 0 : i32
    %c0_i32_2 = arith.constant 0 : i32
    return %arg0, %c0_i32, %c0_i32_0, %c0_i32_1 : i32, i32, i32, i32
  }
  func.func @transform_3(%arg0: i32) -> (i32, i32, i32) {
    %c0_i32 = arith.constant 0 : i32
    %c0_i32_0 = arith.constant 0 : i32
    %c0_i32_1 = arith.constant 0 : i32
    return %arg0, %c0_i32, %c0_i32_0 : i32, i32, i32
  }
  func.func @transform_4(%arg0: i32) -> (i32, i32, i32) {
    %c0_i32 = arith.constant 0 : i32
    %c0_i32_0 = arith.constant 0 : i32
    %c0_i32_1 = arith.constant 0 : i32
    return %arg0, %c0_i32, %c0_i32_0 : i32, i32, i32
  }
}

</mosaic_0001>

<bundles_post_ra>
// kernel: multi_head_attention_block.5
= control target key start
LH: loop header
LB: loop body
LE: loop exit
PB: predicated region body
PF: predicated region fallthrough
CT: control target
= control target key end

     0   :  { %s185_s0 = inlined_call_operand.vmem [shape: f32[16,32], index: 0, kind: input, shape index: {}]   ;;  %s186_s1 = inlined_call_operand.vmem [shape: f32[32,32], index: 1, kind: input, shape index: {}]   ;;  %s187_s2 = inlined_call_operand.vmem [shape: f32[1,32], index: 2, kind: input, shape index: {}]   ;;  %s188_s3 = inlined_call_operand.hbm [shape: f32[16,32], index: 3, kind: output, shape index: {}]  }
   0x1   :  { %v34_v0 = vld [vmem:[%s186_s1 + $0x18] sm:$0xff]  ;;  %v33_v1 = vld [vmem:[%s186_s1 + $0x10] sm:$0xff]  ;;  %v32_v2 = vld [vmem:[%s186_s1 + $0x8] sm:$0xff] }
   0x2   :  { %54 = vmatpush.msra.mxu0 %v34_v0  ;;  %96 = vmatpush.msra.mxu1 %v34_v0  ;;  %v103_v3 = vld [vmem:[%s187_s2] ss:$0 sm:$0xff] }
   0x3   :  { %8 = vsyncpa [#allocation4], 0  ;;  %vm24_vm0 = vcmask 261120   ;;  %v31_v4 = vld [vmem:[%s186_s1] sm:$0xff]  ;;  %v30_v6 = vld [vmem:[%s185_s0 + $0x8] sm:$0xff]  ;;  %s130_s1 = smov [#allocation3]  }
   0x4   :  { %55 = vmatpush.msra.mxu0 %v33_v1  ;;  %97 = vmatpush.msra.mxu1 %v33_v1  ;;  %25 = vst.msk [vmem:[#allocation2] sm:$0xff] %vm24_vm0, %v103_v3  ;;  %v29_v5 = vld [vmem:[%s185_s0] sm:$0xff]  ;;  %s80_s0 = sshll.u32 %s130_s1, 4  ;;  %s82_s27 = sshll.u32 %s188_s3, 4  ;;  %s81_s0 = int_to_ptr.vmem [resolvable:$true] %s80_s0  ;;  %s83_s27 = int_to_ptr.hbm [resolvable:$true] %s82_s27 }
   0x5   :  { %26 = vst.msk [vmem:[#allocation2 + $0x8] sm:$0xff] %vm24_vm0, %v103_v3  ;;  %s131_s28 = smov 128   ;;  %s132_s29 = smov 8  }
   0x6   :  { %56 = vmatpush.msra.mxu0 %v32_v2  ;;  %98 = vmatpush.msra.mxu1 %v32_v2 }
   0x8   :  { %57 = vmatpush.msra.mxu0 %v31_v4  ;;  %99 = vmatpush.msra.mxu1 %v31_v4 }
   0x9   :  { %94 = vmatmul.msk.f32.vlgmr.msra.gmra.mxu0 %vm24_vm0, %v29_v5  ;;  %95 = vmatmul.msk.f32.vlgmr.msra.gmra.mxu1 %vm24_vm0, %v30_v6 }
   0xb   :  { %v27_v7 = vld [vmem:[#allocation2] sm:$0xff] }
   0xc   :  { %v28_v8 = vld [vmem:[#allocation2 + $0x8] sm:$0xff] }
  0x86   :  { %v59_v9 = vpop.f32.mrf.mxu0  ;;  %v62_v10 = vpop.f32.mrf.mxu1 }
  0x87   :  { %v65_v11 = vadd.f32 %v59_v9, %v27_v7  ;;  %v66_v12 = vadd.f32 %v62_v10, %v28_v8 }
  0x89   :  { %67 = vst.msk [vmem:[#allocation2] sm:$0xff] %vm24_vm0, %v65_v11 }
  0x8a   :  { %68 = vst.msk [vmem:[#allocation2 + $0x8] sm:$0xff] %vm24_vm0, %v66_v12 }
  0x90   :  { %v72_v13 = vld [vmem:[#allocation2] sm:$0xff] }
  0x91   :  { %v73_v14 = vld [vmem:[#allocation2 + $0x8] sm:$0xff]  ;;  %74 = vst.msk [vmem:[#allocation3] sm:$0xff] %vm24_vm0, %v72_v13 }
  0x92   :  { %75 = vst.msk [vmem:[#allocation3 + $0x8] sm:$0xff] %vm24_vm0, %v73_v14 }
  0x93   :  { %88 = dma.vmem_to_hbm [thread:$0]  %s81_s0, 256, %s83_s27, [#allocation4], %s131_s28, %s131_s28, %s132_s29  }
  0x94   :  { %128 = dma.done.wait [#allocation4], 256  }
  0x95   :  { %129 = vsyncadd [#allocation4], 4294967040 }
  0x96   :  { %93 = vsyncpa [#allocation4], 1 }

// kernel: multi_head_attention_block.3
= control target key start
LH: loop header
LB: loop body
LE: loop exit
PB: predicated region body
PF: predicated region fallthrough
CT: control target
= control target key end

     0   :  { %8 = vsyncpa [#allocation4], 0  ;;  %s222_s0 = inlined_call_operand.hbm [shape: f32[16,32], index: 0, kind: input, shape index: {}]   ;;  %s223_s1 = inlined_call_operand.hbm [shape: f32[32,96], index: 1, kind: input, shape index: {}]   ;;  %s224_s2 = inlined_call_operand.vmem [shape: f32[1,96], index: 2, kind: input, shape index: {}]   ;;  %s225_s3 = inlined_call_operand.vmem [shape: f32[16,96], index: 3, kind: output, shape index: {}]  }
   0x1   :  { %s14_s14 = sshll.u32 %s222_s0, 4  ;;  %s15_s14 = int_to_ptr.hbm [resolvable:$true] %s14_s14 }
   0x2   :  { %9 = vsyncpa [#allocation6], 0  ;;  %s177_s15 = smov [#allocation3]   ;;  %s27_s19 = sshll.u32 %s223_s1, 4  ;;  %s28_s19 = int_to_ptr.hbm [resolvable:$true] %s27_s19 }
   0x3   :  { %s16_s16 = sshll.u32 %s177_s15, 4  ;;  %s178_s20 = smov 128   ;;  %s17_s16 = int_to_ptr.vmem [resolvable:$true] %s16_s16 }
   0x4   :  { %s179_s21 = smov 8   ;;  %s180_s22 = smov [#allocation5]  }
   0x5   :  { %22 = dma.hbm_to_vmem [thread:$0]  %s15_s14, 256, %s17_s16, [#allocation4], %s178_s20, %s178_s20, %s179_s21  }
   0x6   :  { %s29_s23 = sshll.u32 %s180_s22, 4  ;;  %s30_s23 = int_to_ptr.vmem [resolvable:$true] %s29_s23 }
   0x7   :  { %35 = dma.hbm_to_vmem [thread:$0]  %s28_s19, 512, %s30_s23, [#allocation6], %s178_s20, %s178_s20, %s179_s21  }
   0x8   :  { %173 = dma.done.wait [#allocation4], 256  }
   0x9   :  { %174 = vsyncadd [#allocation4], 4294967040 }
   0xa   :  { %175 = dma.done.wait [#allocation6], 512  }
   0xb   :  { %176 = vsyncadd [#allocation6], 4294966784  ;;  %v65_v0 = vld [vmem:[#allocation5 + $0x18] sm:$0xff]  ;;  %v64_v1 = vld [vmem:[#allocation5 + $0x10] sm:$0xff]  ;;  %vm55_vm0 = vcmask 785408   ;;  %vm66_vm1 = vcmask 261120  }
   0xc   :  { %85 = vmatpush.msra.mxu0 %v65_v0  ;;  %116 = vmatpush.msra.mxu1 %v65_v0  ;;  %v63_v2 = vld [vmem:[#allocation5 + $0x8] sm:$0xff]  ;;  %v124_v3 = vld [vmem:[%s224_s2] ss:$0 sm:$0xff]  ;;  %v60_v5 = vld [vmem:[#allocation3] sm:$0xff] }
   0xd   :  { %v62_v4 = vld [vmem:[#allocation5] sm:$0xff]  ;;  %56 = vst.msk [vmem:[#allocation2] sm:$0xff] %vm55_vm0, %v124_v3  ;;  %v61_v6 = vld [vmem:[#allocation3 + $0x8] sm:$0xff] }
   0xe   :  { %86 = vmatpush.msra.mxu0 %v64_v1  ;;  %117 = vmatpush.msra.mxu1 %v64_v1  ;;  %57 = vst.msk [vmem:[#allocation2 + $0x8] sm:$0xff] %vm55_vm0, %v124_v3 }
  0x10   :  { %87 = vmatpush.msra.mxu0 %v63_v2  ;;  %118 = vmatpush.msra.mxu1 %v63_v2 }
  0x12   :  { %88 = vmatpush.msra.mxu0 %v62_v4  ;;  %119 = vmatpush.msra.mxu1 %v62_v4 }
  0x13   :  { %114 = vmatmul.msk.f32.vlgmr.msra.gmra.mxu0 %vm66_vm1, %v60_v5  ;;  %115 = vmatmul.msk.f32.vlgmr.msra.gmra.mxu1 %vm66_vm1, %v61_v6 }
  0x14   :  { %v58_v7 = vld [vmem:[#allocation2] sm:$0xff] }
  0x15   :  { %v59_v8 = vld [vmem:[#allocation2 + $0x8] sm:$0xff] }
  0x90   :  { %v90_v9 = vpop.f32.mrf.mxu0  ;;  %v93_v10 = vpop.f32.mrf.mxu1 }
  0x91   :  { %v96_v11 = vadd.f32 %v90_v9, %v58_v7  ;;  %v97_v12 = vadd.f32 %v93_v10, %v59_v8 }
  0x93   :  { %99 = vst.msk [vmem:[#allocation2] sm:$0xff] %vm55_vm0, %v96_v11 }
  0x94   :  { %100 = vst.msk [vmem:[#allocation2 + $0x8] sm:$0xff] %vm55_vm0, %v97_v12 }
  0x9a   :  { %v104_v13 = vld [vmem:[#allocation2] sm:$0xff] }
  0x9b   :  { %106 = vst.msk [vmem:[%s225_s3] sm:$0xff] %vm55_vm0, %v104_v13  ;;  %v105_v14 = vld [vmem:[#allocation2 + $0x8] sm:$0xff] }
  0x9c   :  { %107 = vst.msk [vmem:[%s225_s3 + $0x8] sm:$0xff] %vm55_vm0, %v105_v14 }
  0x9d   :  { %112 = vsyncpa [#allocation4], 1 }
  0x9e   :  { %113 = vsyncpa [#allocation6], 1 }

// kernel: multi_head_attention_block.4
= control target key start
LH: loop header
LB: loop body
LE: loop exit
PB: predicated region body
PF: predicated region fallthrough
CT: control target
= control target key end

     0   :  { %s727_s15 = smov 0   ;;  %s802_s0 = inlined_call_operand.vmem [shape: f32[2,4,8,8], index: 0, kind: input, shape index: {}]   ;;  %s803_s1 = inlined_call_operand.vmem [shape: f32[2,4,8,8], index: 1, kind: input, shape index: {}]   ;;  %s804_s2 = inlined_call_operand.vmem [shape: f32[2,4,8,8], index: 2, kind: input, shape index: {}]   ;;  %s805_s3 = inlined_call_operand.vmem [shape: f32[2,1,8], index: 3, kind: input, shape index: {}]   ;;  %s806_s4 = inlined_call_operand.vmem [shape: f32[2,8,32], index: 4, kind: output, shape index: {}]  }
   0x1 LB: > { %s625_s16 = sadd.s32 4294967295, %s697_s15   ;;  %p629_p0 = scmp.ge.s32.totalorder %s697_s15, 1  ;;  %s697_s15 = sphi %s727_s15, %s14_s15  }
   0x2   : > { %p190_p1 = scmp.lt.s32.totalorder %s697_s15, 3 }
   0x4   : > { %p191_p2 = pnand %p629_p0, %p190_p1 }
   0x5   : > { %p228_p3 = scmp.lt.s32.totalorder (!%p191_p2), %s625_s16, 1  ;;  %s699_s30 = smov (!%p191_p2), 8  }
   0x6   : > { %194 = sbr.rel (%p191_p2) target bundleno = 1040 (0x410), region = 36  ;;  %s700_s5 = smov (!%p191_p2), 24  }
   0x7   : > { %s701_s6 = smov (!%p191_p2), 16  }
   0xb   : > { %s808_s16 = smov (!%p228_p3, %s625_s16), 1  ;;  %vm258_vm0 = vcmask 64512   ;;  %vm533_vm1 = vcmask 130048   ;;  %vm535_vm2 = vcmask 195584   ;;  %vm537_vm3 = vcmask 261120  }
   0xc   : > { %s738_s17 = sshll.u32 %s808_s16, 5  ;;  %s245_s20 = scalar_lea.vmem %s805_s3, %s808_s16 }
   0xd   : > { %s748_s23 = scalar_lea.vmem %s803_s1, %s738_s17  ;;  %s754_s26 = scalar_lea.vmem %s802_s0, %s738_s17  ;;  %v674_v9 = vld [vmem:[%s245_s20] ss:$0 sm:$0xff] }
   0xe   : > { %v253_v0 = vld [vmem:[%s748_s23] sm:$0xff]  ;;  %v641_v1 = vld [vmem:[%s748_s23 + $0x8] sm:$0xff]  ;;  %v653_v5 = vld [vmem:[%s748_s23 + $0x18] sm:$0xff]  ;;  %s777_s29 = scalar_lea.vmem %s804_s2, %s738_s17  ;;  %s636_s7 = sshll.u32 %s808_s16, 3 }
   0xf   : > { %v251_v2 = vld [vmem:[%s754_s26] sm:$0xff]  ;;  %637 = vmatpush.xpose.msk.msra.mxu0 %vm258_vm0, %v253_v0  ;;  %643 = vmatpush.xpose.msk.msra.mxu2 %vm258_vm0, %v641_v1  ;;  %v640_v4 = vld [vmem:[%s754_s26 + $0x8] sm:$0xff]  ;;  %v652_v7 = vld [vmem:[%s754_s26 + $0x18] sm:$0xff]  ;;  %s249_s10 = scalar_lea.vmem %s806_s4, %s636_s7 }
  0x10   : > { %v252_v3 = vmul.f32 0.35355338, %v251_v2  ;;  %v321_v6 = vmul.f32 0.35355338, %v640_v4  ;;  %v455_v8 = vmul.f32 0.35355338, %v652_v7 }
  0x11   : > { %v254_v29 = vld [vmem:[%s777_s29] sm:$0xff]  ;;  %v647_v30 = vld [vmem:[%s748_s23 + $0x10] sm:$0xff]  ;;  %v642_v31 = vld [vmem:[%s777_s29 + $0x8] sm:$0xff] }
  0x12   : > { %638 = vmatmul.msk.f32.vlgmr.msra.gmra.mxu0 %vm258_vm0, %v252_v3  ;;  %644 = vmatmul.msk.f32.vlgmr.msra.gmra.mxu2 %vm258_vm0, %v321_v6  ;;  %v646_v37 = vld [vmem:[%s754_s26 + $0x10] sm:$0xff]  ;;  %v654_v50 = vld [vmem:[%s777_s29 + $0x18] sm:$0xff] }
  0x13   : > { %655 = vmatpush.xpose.msk.msrb.mxu0 %vm258_vm0, %v653_v5  ;;  %314 = vmatpush.msra.mxu1 %v254_v29  ;;  %v388_v40 = vmul.f32 0.35355338, %v646_v37  ;;  %v648_v59 = vld [vmem:[%s777_s29 + $0x10] sm:$0xff] }
  0x14   : > { %381 = vmatpush.msra.mxu3 %v642_v31  ;;  %515 = vmatpush.msrb.mxu2 %v654_v50 }
  0x15   : > { %649 = vmatpush.xpose.msk.msrb.mxu1 %vm258_vm0, %v647_v30 }
  0x16   : > { %448 = vmatpush.msrb.mxu3 %v648_v59 }
  0x1a   : > { %656 = vmatmul.msk.f32.vlgmr.msrb.gmra.mxu0 %vm258_vm0, %v455_v8 }
  0x8f   : > { %v282_v10 = vpop.f32.mrf.mxu0 }
  0x90   : > { %v283_v11 = vadd.f32 %v674_v9, %v282_v10 }
  0x92   : > { %v285_v12 = vsel %vm258_vm0, %v283_v11, -inf }
  0x93   : > { %286 = vmax.xlane.f32.xlu0 %v285_v12 }
  0x95   : > { %v349_v13 = vpop.f32.mrf.mxu2 }
  0x96   : > { %v350_v14 = vadd.f32 %v674_v9, %v349_v13 }
  0x97   : > { %v483_v16 = vpop.f32.mrf.mxu0 }
  0x98   : > { %v352_v15 = vsel %vm258_vm0, %v350_v14, -inf  ;;  %v484_v17 = vadd.f32 %v674_v9, %v483_v16 }
  0x99   : > { %353 = vmax.xlane.f32.xlu1 %v352_v15 }
  0x9a   : > { %v486_v18 = vsel %vm258_vm0, %v484_v17, -inf }
  0x9b   : > { %487 = vmax.xlane.f32.xlu2 %v486_v18 }
 0x106   : > { %v287_v19 = vpop.xlane.xlu0 %286 }
 0x107   : > { %v288_v20 = vsub.f32 %v283_v11, %v287_v19 }
 0x109   : > { %v289_v21 = vmul.f32 1.442695, %v288_v20 }
 0x10b   : > { %675 = vpow2.f32 %v289_v21 }
 0x10c   : > { %v354_v22 = vpop.xlane.xlu1 %353 }
 0x10d   : > { %v355_v23 = vsub.f32 %v350_v14, %v354_v22 }
 0x10e   : > { %v488_v32 = vpop.xlane.xlu2 %487 }
 0x10f   : > { %v356_v24 = vmul.f32 1.442695, %v355_v23  ;;  %v489_v41 = vsub.f32 %v484_v17, %v488_v32 }
 0x111   : > { %v676_v25 = vpop.eup %675  ;;  %677 = vpow2.f32 %v356_v24  ;;  %v490_v43 = vmul.f32 1.442695, %v489_v41 }
 0x112   : > { %v291_v26 = vsel %vm258_vm0, %v676_v25, 0.0 }
 0x113   : > { %292 = vadd.xlane.f32.xlu0 %v291_v26 }
 0x117   : > { %v678_v27 = vpop.eup %677 }
 0x118   : > { %v358_v28 = vsel %vm258_vm0, %v678_v27, 0.0 }
 0x119   : > { %359 = vadd.xlane.f32.xlu2 %v358_v28 }
 0x186   : > { %v293_v33 = vpop.xlane.xlu0 %292 }
 0x187   : > { %679 = vrcp.f32 %v293_v33 }
 0x18c   : > { %v360_v34 = vpop.xlane.xlu2 %359 }
 0x18d   : > { %v680_v35 = vpop.eup %679  ;;  %681 = vrcp.f32 %v360_v34 }
 0x18e   : > { %v295_v36 = vmul.f32 %v680_v35, %v676_v25  ;;  %683 = vpow2.f32 %v490_v43 }
 0x190   : > { %639 = vmatmul.msk.f32.vlgmr.msra.gmra.mxu1 %vm258_vm0, %v295_v36 }
 0x193   : > { %v682_v38 = vpop.eup %681 }
 0x194   : > { %v362_v39 = vmul.f32 %v682_v38, %v678_v27  ;;  %v684_v48 = vpop.eup %683 }
 0x195   : > { %v492_v49 = vsel %vm258_vm0, %v684_v48, 0.0 }
 0x196   : > { %645 = vmatmul.msk.f32.vlgmr.msra.gmra.mxu3 %vm258_vm0, %v362_v39 }
 0x198   : > { %650 = vmatmul.msk.f32.vlgmr.msrb.gmra.mxu1 %vm258_vm0, %v388_v40 }
 0x20d   : > { %v316_v42 = vpop.f32.mrf.mxu1 }
 0x215   : > { %v416_v44 = vpop.f32.mrf.mxu1 }
 0x216   : > { %v417_v45 = vadd.f32 %v674_v9, %v416_v44 }
 0x218   : > { %v419_v46 = vsel %vm258_vm0, %v417_v45, -inf }
 0x219   : > { %v383_v47 = vpop.f32.mrf.mxu3  ;;  %420 = vmax.xlane.f32.xlu1 %v419_v46 }
 0x21a   : > { %521 = vrot.lane.b32.xlu2 %v383_v47, %s699_s30 }
 0x221   : > { %493 = vadd.xlane.f32.xlu1 %v492_v49 }
 0x274   : > { %v522_v1 = vpop.permute.xlu2 %521 }
 0x275   : > { %v532_v2 = vsel %vm258_vm0, %v316_v42, %v522_v1 }
 0x28c   : > { %v421_v51 = vpop.xlane.xlu1 %420 }
 0x28d   : > { %v422_v52 = vsub.f32 %v417_v45, %v421_v51 }
 0x28f   : > { %v423_v53 = vmul.f32 1.442695, %v422_v52 }
 0x291   : > { %685 = vpow2.f32 %v423_v53 }
 0x294   : > { %v494_v54 = vpop.xlane.xlu1 %493 }
 0x295   : > { %687 = vrcp.f32 %v494_v54 }
 0x297   : > { %v686_v55 = vpop.eup %685 }
 0x298   : > { %v425_v56 = vsel %vm258_vm0, %v686_v55, 0.0 }
 0x299   : > { %426 = vadd.xlane.f32.xlu0 %v425_v56 }
 0x29b   : > { %v688_v57 = vpop.eup %687 }
 0x29c   : > { %v496_v58 = vmul.f32 %v688_v57, %v684_v48 }
 0x29e   : > { %657 = vmatmul.msk.f32.vlgmr.msrb.gmra.mxu2 %vm258_vm0, %v496_v58 }
 0x30c   : > { %v427_v60 = vpop.xlane.xlu0 %426 }
 0x30d   : > { %689 = vrcp.f32 %v427_v60 }
 0x313   : > { %v690_v61 = vpop.eup %689 }
 0x314   : > { %v429_v62 = vmul.f32 %v690_v61, %v686_v55 }
 0x316   : > { %651 = vmatmul.msk.f32.vlgmr.msrb.gmra.mxu3 %vm258_vm0, %v429_v62 }
 0x321   : > { %v517_v63 = vpop.f32.mrf.mxu2 }
 0x322   : > { %529 = vrot.lane.b32.xlu1 %v517_v63, %s700_s5 }
 0x394   : > { %v530_v4 = vpop.permute.xlu1 %529 }
 0x399   : > { %v450_v0 = vpop.f32.mrf.mxu3 }
 0x39a   : > { %525 = vrot.lane.b32.xlu0 %v450_v0, %s701_s6 }
 0x40c   : > { %v526_v3 = vpop.permute.xlu0 %525 }
 0x40d   : > { %v534_v5 = vsel %vm533_vm1, %v532_v2, %v526_v3 }
 0x40e   : > { %v536_v6 = vsel %vm535_vm2, %v534_v5, %v530_v4 }
 0x40f   : > { %538 = vst.msk [vmem:[%s249_s10] sm:$0xff] %vm537_vm3, %v536_v6 }
 0x410 PF: > { %s14_s15 = sadd.s32 1, %s697_s15  }
 0x411   : > { %p11_p4 = scmp.ge.s32.totalorder %s14_s15, 4  }
 0x413   :  { %13 = sbr.rel (!%p11_p4) target bundleno = 1 (0x1), region = 84 }

</bundles_post_ra>
